<compile_context>
chip_gen: v5e
topology: v5e:2x2
jax: 0.10.0
libtpu: 0.0.40
codegen_flags: <defaults>
</compile_context>

<pallas_src>
import jax
import jax.numpy as jnp
from jax import lax
from jax.experimental import pallas as pl
from jax.experimental.pallas import tpu as pltpu


def _make_kernel(N, Cin, C1, C2, H, W):
    Hp, Wp = H + 2, W + 2
    Sp = Hp * Wp                  # flattened zero-padded spatial size (324)
    L = Wp + 1                    # max |tap offset| == lane-flank width (19)
    Spw = Sp + 2 * L              # flanked spatial width (362)
    R1 = N * C1
    offs = [(kh - 1) * Wp + (kw - 1) for kh in range(3) for kw in range(3)]

    def kernel(xw_ref, w1_ref, w2_ref, b1_ref, b2_ref, mask_ref, o_ref, h1w_ref):
        # xw_ref  : (N*Cin, Spw)  zero-flanked, flattened, zero-padded input
        # w1_ref  : (N*C1, 9*N*Cin) batch-block-diag BN1-folded conv1 weights
        # w2_ref  : (N*C2, 9*N*C1)  batch-block-diag BN2-folded conv2 weights
        # b1_ref  : (N*C1, 1)    folded BN1 bias (per output row)
        # b2_ref  : (N*C2, 1)    folded BN2 bias
        # mask_ref: (1, Sp)      1.0 on interior pixels of the padded grid
        # o_ref   : (N*C2, Sp)   output slab (halo lanes junk; host drops them)
        # h1w_ref : (N*C1, Spw)  VMEM scratch: zero-flanked conv1 activation

        def patches(ref):
            # Stack the 9 shifted tap windows along sublanes -> (9*rows, Sp).
            # Each window is one full sublane tile x 3 lane tiles, so the
            # sublane concatenation is 8-row aligned (no relayout).
            return jnp.concatenate(
                [ref[:, L + o: L + o + Sp] for o in offs], axis=0)

        # ---- conv1 (+BN1 scale folded) as one lane-dense MXU matmul ----
        h1 = jnp.dot(w1_ref[...], patches(xw_ref),
                     preferred_element_type=jnp.float32)
        # BN1 bias (lane-broadcast add), ReLU, then zero the halo pixels so
        # conv2's shifted windows read correct zero padding.
        h1 = jnp.maximum(h1 + b1_ref[...], 0.0) * mask_ref[...]

        # Stash into the zero-flanked scratch (flanks stay zero so all 9
        # conv2 windows are in-bounds and read zeros outside the image).
        h1w_ref[...] = jnp.zeros((R1, Spw), jnp.float32)
        h1w_ref[:, L:L + Sp] = h1

        # ---- conv2 (+BN2 scale folded) + bias ----
        h2 = jnp.dot(w2_ref[...], patches(h1w_ref),
                     preferred_element_type=jnp.float32) + b2_ref[...]

        # residual add (downsample=None, Cin == C2, rows already NCHW-ordered)
        ident = xw_ref[:, L:L + Sp]
        o_ref[...] = jnp.maximum(h2 + ident, 0.0)

    return kernel


def fold_bn(gamma, beta, mean, var, eps=1e-5):
    scale = gamma / jnp.sqrt(var + eps)
    bias = beta - mean * scale
    return scale, bias


def _block_diag_conv_weight(w_oihw, scale, n_batch):
    """(Cout,Cin,3,3) conv weight + BN scale -> (N*Cout, 9*N*Cin) matrix.

    Rows are batch-major then cout (matches NCHW slab rows); columns are
    tap-major (t = kh*3 + kw), then batch, then cin, matching the in-kernel
    patch-slab ordering.  Cross-batch blocks are zero (block-diagonal).
    """
    w = w_oihw * scale[:, None, None, None]            # fold BN scale
    eye = jnp.eye(n_batch, dtype=w.dtype)
    blocks = [jnp.kron(eye, w[:, :, kh, kw])            # (N*Cout, N*Cin) per tap
              for kh in range(3) for kw in range(3)]
    return jnp.concatenate(blocks, axis=1)               # (N*Cout, 9*N*Cin)


def res_basic_block(x_nchw, w1_oihw, bn1, w2_oihw, bn2, eps=1e-5):
    N, Cin, H, W = x_nchw.shape
    C1 = w1_oihw.shape[0]
    C2 = w2_oihw.shape[0]
    assert Cin == C2, "identity path requires Cin == Cout (downsample=None)"

    Hp, Wp = H + 2, W + 2
    Sp = Hp * Wp
    L = Wp + 1
    Spw = Sp + 2 * L

    s1, b1 = fold_bn(*bn1, eps)
    s2, b2 = fold_bn(*bn2, eps)
    w1_big = _block_diag_conv_weight(w1_oihw, s1, N)     # (N*C1, 9*N*Cin)
    w2_big = _block_diag_conv_weight(w2_oihw, s2, N)     # (N*C2, 9*N*C1)
    b1_col = jnp.tile(b1, N)[:, None]                    # (N*C1, 1)
    b2_col = jnp.tile(b2, N)[:, None]                    # (N*C2, 1)

    # Host layout plumbing (no compute): NCHW -> spatially zero-padded ->
    # flattened (N*Cin, Sp) -> lane-flanked (N*Cin, Spw) slab.  Channels live
    # in sublanes, spatial in lanes; NCHW needs no transpose for this.
    xp = jnp.pad(x_nchw, ((0, 0), (0, 0), (1, 1), (1, 1)))
    x_wide = jnp.pad(xp.reshape(N * Cin, Sp), ((0, 0), (L, L)))

    # Interior mask over the flattened padded grid (1 inside, 0 on the halo).
    mask = jnp.zeros((Hp, Wp), jnp.float32).at[1:H + 1, 1:W + 1].set(1.0)
    mask = mask.reshape(1, Sp)

    kernel = _make_kernel(N, Cin, C1, C2, H, W)

    out = pl.pallas_call(
        kernel,
        out_shape=jax.ShapeDtypeStruct((N * C2, Sp), jnp.float32),
        grid=(1,),
        in_specs=[
            pl.BlockSpec((N * Cin, Spw), lambda i: (0, 0)),
            pl.BlockSpec((N * C1, 9 * N * Cin), lambda i: (0, 0)),
            pl.BlockSpec((N * C2, 9 * N * C1), lambda i: (0, 0)),
            pl.BlockSpec((N * C1, 1), lambda i: (0, 0)),
            pl.BlockSpec((N * C2, 1), lambda i: (0, 0)),
            pl.BlockSpec((1, Sp), lambda i: (0, 0)),
        ],
        out_specs=pl.BlockSpec((N * C2, Sp), lambda i: (0, 0)),
        scratch_shapes=[pltpu.VMEM((N * C1, Spw), jnp.float32)],
        compiler_params=pltpu.CompilerParams(
            dimension_semantics=("arbitrary",)),
    )(x_wide, w1_big, w2_big, b1_col, b2_col, mask)

    # (N*C2, Sp) is flattened zero-padded NCHW: reshape and drop the halo.
    return out.reshape(N, C2, Hp, Wp)[:, :, 1:H + 1, 1:W + 1]


def reference_forward(x_nchw, w1_oihw, bn1, w2_oihw, bn2, eps=1e-5):
    """Pure-JAX reference (unfolded conv + BN affine), output in NCHW."""
    s1, b1 = fold_bn(*bn1, eps)
    s2, b2 = fold_bn(*bn2, eps)
    x = jnp.transpose(x_nchw, (0, 2, 3, 1))
    w1 = jnp.transpose(w1_oihw, (2, 3, 1, 0))
    w2 = jnp.transpose(w2_oihw, (2, 3, 1, 0))
    dn1 = lax.conv_dimension_numbers(x.shape, w1.shape, ("NHWC", "HWIO", "NHWC"))
    out = lax.conv_general_dilated(x, w1, (1, 1), "SAME", dimension_numbers=dn1)
    out = jnp.maximum(out * s1 + b1, 0.0)
    dn2 = lax.conv_dimension_numbers(out.shape, w2.shape, ("NHWC", "HWIO", "NHWC"))
    out = lax.conv_general_dilated(out, w2, (1, 1), "SAME", dimension_numbers=dn2)
    out = out * s2 + b2
    out = jnp.maximum(out + x, 0.0)
    return jnp.transpose(out, (0, 3, 1, 2))


if __name__ == "__main__":
    # Module hyperparameters (small, consistent with the PyTorch __init__).
    inplanes, planes = 4, 4
    compress_rate = [0.0, 0.0]
    C1 = int(planes * (1 - compress_rate[0]))
    C2 = int(planes * (1 - compress_rate[1]))
    N, H, W = 2, 16, 16

    key = jax.random.PRNGKey(0)
    k = jax.random.split(key, 8)

    # Input / weights in PyTorch layouts (NCHW, OIHW), deterministic init.
    x_nchw = jax.random.normal(k[0], (N, inplanes, H, W), dtype=jnp.float32)
    w1_oihw = 0.1 * jax.random.normal(k[1], (C1, inplanes, 3, 3), dtype=jnp.float32)
    w2_oihw = 0.1 * jax.random.normal(k[2], (C2, C1, 3, 3), dtype=jnp.float32)

    # BatchNorm parameters (eval-mode running stats), deterministic.
    g1 = 1.0 + 0.1 * jax.random.normal(k[3], (C1,), dtype=jnp.float32)
    be1 = 0.1 * jax.random.normal(k[4], (C1,), dtype=jnp.float32)
    m1 = 0.1 * jax.random.normal(k[5], (C1,), dtype=jnp.float32)
    v1 = jnp.abs(jax.random.normal(k[6], (C1,), dtype=jnp.float32)) + 0.5
    g2 = jnp.ones((C2,), jnp.float32)
    be2 = jnp.zeros((C2,), jnp.float32)
    m2 = 0.05 * jax.random.normal(k[7], (C2,), dtype=jnp.float32)
    v2 = jnp.ones((C2,), jnp.float32)
    bn1 = (g1, be1, m1, v1)
    bn2 = (g2, be2, m2, v2)

    out_nchw = res_basic_block(x_nchw, w1_oihw, bn1, w2_oihw, bn2)
    out_nchw = jax.block_until_ready(out_nchw)

    ref_nchw = jax.block_until_ready(
        reference_forward(x_nchw, w1_oihw, bn1, w2_oihw, bn2))
    assert out_nchw.shape == (N, C2, H, W)
    max_err = float(jnp.max(jnp.abs(out_nchw - ref_nchw)))
    assert max_err < 1e-4, f"mismatch vs reference: {max_err}"

    print("KERNEL_OK")
</pallas_src>

<mosaic_0001>
module attributes {stable_mosaic.version = 11 : i64} {
  func.func @kernel(%arg0: i32, %arg1: memref<8x362xf32, #tpu.memory_space<vmem>>, %arg2: memref<8x72xf32, #tpu.memory_space<vmem>>, %arg3: memref<8x72xf32, #tpu.memory_space<vmem>>, %arg4: memref<8x1xf32, #tpu.memory_space<vmem>>, %arg5: memref<8x1xf32, #tpu.memory_space<vmem>>, %arg6: memref<1x324xf32, #tpu.memory_space<vmem>>, %arg7: memref<8x324xf32, #tpu.memory_space<vmem>>, %arg8: memref<8x362xf32, #tpu.memory_space<vmem>>) attributes {dimension_semantics = [#tpu.dimension_semantics<arbitrary>], iteration_bounds = array<i64: 1>, scalar_prefetch = 0 : i64, scratch_operands = 1 : i64, tpu.core_type = #tpu.core_type<tc>, window_params = [{pipeline_mode = #tpu.pipeline_mode<synchronous>, transform_indices = @transform_0, window_bounds = array<i64: 8, 362>}, {pipeline_mode = #tpu.pipeline_mode<synchronous>, transform_indices = @transform_1, window_bounds = array<i64: 8, 72>}, {pipeline_mode = #tpu.pipeline_mode<synchronous>, transform_indices = @transform_2, window_bounds = array<i64: 8, 72>}, {pipeline_mode = #tpu.pipeline_mode<synchronous>, transform_indices = @transform_3, window_bounds = array<i64: 8, 1>}, {pipeline_mode = #tpu.pipeline_mode<synchronous>, transform_indices = @transform_4, window_bounds = array<i64: 8, 1>}, {pipeline_mode = #tpu.pipeline_mode<synchronous>, transform_indices = @transform_5, window_bounds = array<i64: 1, 324>}, {pipeline_mode = #tpu.pipeline_mode<synchronous>, transform_indices = @transform_6, window_bounds = array<i64: 8, 324>}]} {
    %c0 = arith.constant 0 : index
    %c0_0 = arith.constant 0 : index
    %0 = vector.load %arg2[%c0, %c0_0] : memref<8x72xf32, #tpu.memory_space<vmem>>, vector<8x72xf32>
    %c0_1 = arith.constant 0 : index
    %c0_2 = arith.constant 0 : index
    %1 = vector.load %arg1[%c0_1, %c0_2] : memref<8x362xf32, #tpu.memory_space<vmem>>, vector<8x324xf32>
    %c0_3 = arith.constant 0 : index
    %c1 = arith.constant 1 : index
    %2 = vector.load %arg1[%c0_3, %c1] : memref<8x362xf32, #tpu.memory_space<vmem>>, vector<8x324xf32>
    %c0_4 = arith.constant 0 : index
    %c2 = arith.constant 2 : index
    %3 = vector.load %arg1[%c0_4, %c2] : memref<8x362xf32, #tpu.memory_space<vmem>>, vector<8x324xf32>
    %c0_5 = arith.constant 0 : index
    %c18 = arith.constant 18 : index
    %4 = vector.load %arg1[%c0_5, %c18] : memref<8x362xf32, #tpu.memory_space<vmem>>, vector<8x324xf32>
    %c0_6 = arith.constant 0 : index
    %c19 = arith.constant 19 : index
    %5 = vector.load %arg1[%c0_6, %c19] : memref<8x362xf32, #tpu.memory_space<vmem>>, vector<8x324xf32>
    %c0_7 = arith.constant 0 : index
    %c20 = arith.constant 20 : index
    %6 = vector.load %arg1[%c0_7, %c20] : memref<8x362xf32, #tpu.memory_space<vmem>>, vector<8x324xf32>
    %c0_8 = arith.constant 0 : index
    %c36 = arith.constant 36 : index
    %7 = vector.load %arg1[%c0_8, %c36] : memref<8x362xf32, #tpu.memory_space<vmem>>, vector<8x324xf32>
    %c0_9 = arith.constant 0 : index
    %c37 = arith.constant 37 : index
    %8 = vector.load %arg1[%c0_9, %c37] : memref<8x362xf32, #tpu.memory_space<vmem>>, vector<8x324xf32>
    %c0_10 = arith.constant 0 : index
    %c38 = arith.constant 38 : index
    %9 = vector.load %arg1[%c0_10, %c38] : memref<8x362xf32, #tpu.memory_space<vmem>>, vector<8x324xf32>
    %10 = tpu.concatenate %1, %2, %3, %4, %5, %6, %7, %8, %9 in 0 : vector<8x324xf32>, vector<8x324xf32>, vector<8x324xf32>, vector<8x324xf32>, vector<8x324xf32>, vector<8x324xf32>, vector<8x324xf32>, vector<8x324xf32>, vector<8x324xf32> -> vector<72x324xf32>
    %cst = arith.constant dense<0.000000e+00> : vector<8x324xf32>
    %11 = tpu.matmul %0, %10, %cst {dimension_numbers = #tpu.dot_dimension_numbers<[1], [0], [0], [1], [0, 0, 1, 1], [], []>} : vector<8x72xf32>, vector<72x324xf32>, vector<8x324xf32> -> vector<8x324xf32>
    %c0_11 = arith.constant 0 : index
    %c0_12 = arith.constant 0 : index
    %12 = vector.load %arg4[%c0_11, %c0_12] : memref<8x1xf32, #tpu.memory_space<vmem>>, vector<8x1xf32>
    %13 = vector.broadcast %12 : vector<8x1xf32> to vector<8x324xf32>
    %14 = arith.addf %11, %13 : vector<8x324xf32>
    %cst_13 = arith.constant 0.000000e+00 : f32
    %15 = vector.broadcast %cst_13 : f32 to vector<8x324xf32>
    %16 = arith.maximumf %14, %15 : vector<8x324xf32>
    %c0_14 = arith.constant 0 : index
    %c0_15 = arith.constant 0 : index
    %17 = vector.load %arg6[%c0_14, %c0_15] : memref<1x324xf32, #tpu.memory_space<vmem>>, vector<1x324xf32>
    %18 = vector.broadcast %17 : vector<1x324xf32> to vector<8x324xf32>
    %19 = arith.mulf %16, %18 : vector<8x324xf32>
    %cst_16 = arith.constant 0.000000e+00 : f32
    %20 = vector.broadcast %cst_16 : f32 to vector<8x362xf32>
    %c0_17 = arith.constant 0 : index
    %c0_18 = arith.constant 0 : index
    %21 = vector.load %arg8[%c0_17, %c0_18] : memref<8x362xf32, #tpu.memory_space<vmem>>, vector<8x362xf32>
    tpu.vector_store %arg8[%c0_17, %c0_18], %20 {strides = array<i32>} : memref<8x362xf32, #tpu.memory_space<vmem>>, vector<8x362xf32>,
    %c0_19 = arith.constant 0 : index
    %c19_20 = arith.constant 19 : index
    %22 = vector.load %arg8[%c0_19, %c19_20] : memref<8x362xf32, #tpu.memory_space<vmem>>, vector<8x324xf32>
    tpu.vector_store %arg8[%c0_19, %c19_20], %19 {strides = array<i32>} : memref<8x362xf32, #tpu.memory_space<vmem>>, vector<8x324xf32>,
    %c0_21 = arith.constant 0 : index
    %c0_22 = arith.constant 0 : index
    %23 = vector.load %arg3[%c0_21, %c0_22] : memref<8x72xf32, #tpu.memory_space<vmem>>, vector<8x72xf32>
    %c0_23 = arith.constant 0 : index
    %c0_24 = arith.constant 0 : index
    %24 = vector.load %arg8[%c0_23, %c0_24] : memref<8x362xf32, #tpu.memory_space<vmem>>, vector<8x324xf32>
    %c0_25 = arith.constant 0 : index
    %c1_26 = arith.constant 1 : index
    %25 = vector.load %arg8[%c0_25, %c1_26] : memref<8x362xf32, #tpu.memory_space<vmem>>, vector<8x324xf32>
    %c0_27 = arith.constant 0 : index
    %c2_28 = arith.constant 2 : index
    %26 = vector.load %arg8[%c0_27, %c2_28] : memref<8x362xf32, #tpu.memory_space<vmem>>, vector<8x324xf32>
    %c0_29 = arith.constant 0 : index
    %c18_30 = arith.constant 18 : index
    %27 = vector.load %arg8[%c0_29, %c18_30] : memref<8x362xf32, #tpu.memory_space<vmem>>, vector<8x324xf32>
    %c0_31 = arith.constant 0 : index
    %c19_32 = arith.constant 19 : index
    %28 = vector.load %arg8[%c0_31, %c19_32] : memref<8x362xf32, #tpu.memory_space<vmem>>, vector<8x324xf32>
    %c0_33 = arith.constant 0 : index
    %c20_34 = arith.constant 20 : index
    %29 = vector.load %arg8[%c0_33, %c20_34] : memref<8x362xf32, #tpu.memory_space<vmem>>, vector<8x324xf32>
    %c0_35 = arith.constant 0 : index
    %c36_36 = arith.constant 36 : index
    %30 = vector.load %arg8[%c0_35, %c36_36] : memref<8x362xf32, #tpu.memory_space<vmem>>, vector<8x324xf32>
    %c0_37 = arith.constant 0 : index
    %c37_38 = arith.constant 37 : index
    %31 = vector.load %arg8[%c0_37, %c37_38] : memref<8x362xf32, #tpu.memory_space<vmem>>, vector<8x324xf32>
    %c0_39 = arith.constant 0 : index
    %c38_40 = arith.constant 38 : index
    %32 = vector.load %arg8[%c0_39, %c38_40] : memref<8x362xf32, #tpu.memory_space<vmem>>, vector<8x324xf32>
    %33 = tpu.concatenate %24, %25, %26, %27, %28, %29, %30, %31, %32 in 0 : vector<8x324xf32>, vector<8x324xf32>, vector<8x324xf32>, vector<8x324xf32>, vector<8x324xf32>, vector<8x324xf32>, vector<8x324xf32>, vector<8x324xf32>, vector<8x324xf32> -> vector<72x324xf32>
    %cst_41 = arith.constant dense<0.000000e+00> : vector<8x324xf32>
    %34 = tpu.matmul %23, %33, %cst_41 {dimension_numbers = #tpu.dot_dimension_numbers<[1], [0], [0], [1], [0, 0, 1, 1], [], []>} : vector<8x72xf32>, vector<72x324xf32>, vector<8x324xf32> -> vector<8x324xf32>
    %c0_42 = arith.constant 0 : index
    %c0_43 = arith.constant 0 : index
    %35 = vector.load %arg5[%c0_42, %c0_43] : memref<8x1xf32, #tpu.memory_space<vmem>>, vector<8x1xf32>
    %36 = vector.broadcast %35 : vector<8x1xf32> to vector<8x324xf32>
    %37 = arith.addf %34, %36 : vector<8x324xf32>
    %c0_44 = arith.constant 0 : index
    %c19_45 = arith.constant 19 : index
    %38 = vector.load %arg1[%c0_44, %c19_45] : memref<8x362xf32, #tpu.memory_space<vmem>>, vector<8x324xf32>
    %39 = arith.addf %37, %38 : vector<8x324xf32>
    %cst_46 = arith.constant 0.000000e+00 : f32
    %40 = vector.broadcast %cst_46 : f32 to vector<8x324xf32>
    %41 = arith.maximumf %39, %40 : vector<8x324xf32>
    %c0_47 = arith.constant 0 : index
    %c0_48 = arith.constant 0 : index
    %42 = vector.load %arg7[%c0_47, %c0_48] : memref<8x324xf32, #tpu.memory_space<vmem>>, vector<8x324xf32>
    tpu.vector_store %arg7[%c0_47, %c0_48], %41 {strides = array<i32>} : memref<8x324xf32, #tpu.memory_space<vmem>>, vector<8x324xf32>,
    return
  }
  func.func @transform_0(%arg0: i32) -> (i32, i32) {
    %c0_i32 = arith.constant 0 : i32
    %c0_i32_0 = arith.constant 0 : i32
    %c0_i32_1 = arith.constant 0 : i32
    return %c0_i32, %c0_i32_0 : i32, i32
  }
  func.func @transform_1(%arg0: i32) -> (i32, i32) {
    %c0_i32 = arith.constant 0 : i32
    %c0_i32_0 = arith.constant 0 : i32
    %c0_i32_1 = arith.constant 0 : i32
    return %c0_i32, %c0_i32_0 : i32, i32
  }
  func.func @transform_2(%arg0: i32) -> (i32, i32) {
    %c0_i32 = arith.constant 0 : i32
    %c0_i32_0 = arith.constant 0 : i32
    %c0_i32_1 = arith.constant 0 : i32
    return %c0_i32, %c0_i32_0 : i32, i32
  }
  func.func @transform_3(%arg0: i32) -> (i32, i32) {
    %c0_i32 = arith.constant 0 : i32
    %c0_i32_0 = arith.constant 0 : i32
    %c0_i32_1 = arith.constant 0 : i32
    return %c0_i32, %c0_i32_0 : i32, i32
  }
  func.func @transform_4(%arg0: i32) -> (i32, i32) {
    %c0_i32 = arith.constant 0 : i32
    %c0_i32_0 = arith.constant 0 : i32
    %c0_i32_1 = arith.constant 0 : i32
    return %c0_i32, %c0_i32_0 : i32, i32
  }
  func.func @transform_5(%arg0: i32) -> (i32, i32) {
    %c0_i32 = arith.constant 0 : i32
    %c0_i32_0 = arith.constant 0 : i32
    %c0_i32_1 = arith.constant 0 : i32
    return %c0_i32, %c0_i32_0 : i32, i32
  }
  func.func @transform_6(%arg0: i32) -> (i32, i32) {
    %c0_i32 = arith.constant 0 : i32
    %c0_i32_0 = arith.constant 0 : i32
    %c0_i32_1 = arith.constant 0 : i32
    return %c0_i32, %c0_i32_0 : i32, i32
  }
}

</mosaic_0001>

<bundles_post_ra>
// kernel: tpu_custom_call.1
= control target key start
LH: loop header
LB: loop body
LE: loop exit
PB: predicated region body
PF: predicated region fallthrough
CT: control target
= control target key end

     0   :  { %11 = vsyncpa [#allocation4], 0  ;;  %s795_s0 = inlined_call_operand.hbm [shape: f32[8,362], index: 0, kind: input, shape index: {}]   ;;  %s796_s1 = inlined_call_operand.vmem [shape: f32[8,72], index: 1, kind: input, shape index: {}]   ;;  %s797_s2 = inlined_call_operand.vmem [shape: f32[8,72], index: 2, kind: input, shape index: {}]   ;;  %s798_s3 = inlined_call_operand.vmem [shape: f32[8,1], index: 3, kind: input, shape index: {}]   ;;  %s799_s4 = inlined_call_operand.vmem [shape: f32[8,1], index: 4, kind: input, shape index: {}]   ;;  %s800_s5 = inlined_call_operand.vmem [shape: f32[1,324], index: 5, kind: input, shape index: {}]   ;;  %s801_s6 = inlined_call_operand.hbm [shape: f32[8,324], index: 6, kind: output, shape index: {}]  }
   0x1   :  { %12 = vsyncpa [#allocation5], 0  ;;  %s18_s23 = sshll.u32 %s795_s0, 4  ;;  %s610_s24 = smov [#allocation3]   ;;  %s19_s23 = int_to_ptr.hbm [resolvable:$true] %s18_s23 }
   0x2   :  { %s20_s25 = sshll.u32 %s610_s24, 4  ;;  %s21_s25 = int_to_ptr.vmem [resolvable:$true] %s20_s25 }
   0x3   :  { %23 = dma.hbm_to_vmem [thread:$0]  %s19_s23, 384, %s21_s25, [#allocation4]  }
   0x4   :  { %606 = dma.done.wait [#allocation4], 384  }
   0x5   :  { %607 = vsyncadd [#allocation4], 4294966912  ;;  %v661_v0 = vld [vmem:[#allocation3] sm:$0xff]  ;;  %v663_v1 = vld [vmem:[#allocation3 + $0x8] sm:$0xff]  ;;  %s611_s26 = smov 91   ;;  %s612_s27 = smov 90  }
   0x6   :  { %v481_v2 = vpack.i.bf16 %v663_v1, %v661_v0  ;;  %s613_s0 = smov 92   ;;  %v670_v3 = vld [vmem:[#allocation3 + $0x10] sm:$0xff]  ;;  %s614_s28 = smov 108   ;;  %vm135_vm0 = vcmask 736256   ;;  %vm123_vm1 = vcmask 744448   ;;  %vm111_vm2 = vcmask 752640  }
   0x7   :  { %s615_s29 = smov 109   ;;  %s616_s30 = smov 110   ;;  %v141_v23 = vld [vmem:[%s798_s3] sm:$0xff]  ;;  %v619_v24 = vmov 0   ;;  %vm99_vm3 = vcmask 883712   ;;  %vm87_vm4 = vcmask 891904  }
   0x8   :  { %482 = vrot.lane.b32.xlu1 %v481_v2, %s611_s26  ;;  %477 = vrot.lane.b32.xlu0 %v481_v2, %s612_s27  ;;  %s617_s7 = smov 126   ;;  %s618_s8 = smov 127   ;;  %vm75_vm5 = vcmask 900096   ;;  %vm63_vm6 = vcmask 1031168   ;;  %vm51_vm7 = vcmask 1039360   ;;  %v38_v52 = vld [vmem:[%s796_s1] sm:$0xff] }
   0x9   :  { %487 = vrot.lane.b32.xlu2 %v481_v2, %s613_s0  ;;  %516 = vset.pattern.permute.xlu1 %v619_v24  ;;  %vm147_vm8 = vcmask 588800   ;;  %v620_v55 = vmov 0.0   ;;  %v214_v57 = vld [vmem:[%s800_s5] sm:$0x7]  ;;  %s621_s13 = smov 19   ;;  %vm244_vm9 = vcmask 1047704  }
   0xa   :  { %557 = vset.pattern.permute.xlu0 %v619_v24  ;;  %225 = vst [vmem:[#allocation2] sm:$0xff] %v620_v55  ;;  %v216_v60 = vperm.slane %v214_v57, 0  ;;  %vm227_vm10 = vcmask 867328   ;;  %vm238_vm11 = vcmask 154624   ;;  %vm247_vm12 = vcmask 711680   ;;  %s447_s19 = sshll.u32 %s801_s6, 4  ;;  %s448_s19 = int_to_ptr.hbm [resolvable:$true] %s447_s19 }
   0xb   :  { %228 = vst.msk [vmem:[#allocation2 + $0x10] sm:$0xff] %vm227_vm10, %v620_v55  ;;  %vm438_vm13 = vcmask 556032  }
  0x10   :  { %121 = vrot.lane.b32.xlu1 %v670_v3, %s611_s26  ;;  %133 = vrot.lane.b32.xlu0 %v670_v3, %s612_s27 }
  0x11   :  { %109 = vrot.lane.b32.xlu2 %v670_v3, %s613_s0 }
  0x18   :  { %492 = vrot.lane.b32.xlu0 %v481_v2, %s614_s28  ;;  %97 = vrot.lane.b32.xlu1 %v670_v3, %s614_s28 }
  0x19   :  { %497 = vrot.lane.b32.xlu2 %v481_v2, %s615_s29 }
  0x20   :  { %85 = vrot.lane.b32.xlu0 %v670_v3, %s615_s29  ;;  %502 = vrot.lane.b32.xlu1 %v481_v2, %s616_s30 }
  0x21   :  { %73 = vrot.lane.b32.xlu2 %v670_v3, %s616_s30 }
  0x28   :  { %507 = vrot.lane.b32.xlu0 %v481_v2, %s617_s7  ;;  %61 = vrot.lane.b32.xlu1 %v670_v3, %s617_s7 }
  0x29   :  { %512 = vrot.lane.b32.xlu2 %v481_v2, %s618_s8 }
  0x30   :  { %49 = vrot.lane.b32.xlu0 %v670_v3, %s618_s8  ;;  %144 = vperm.xlu1 %516, %v141_v23  }
  0x63   :  { %v488_v4 = vpop.permute.xlu2 %487 }
  0x64   :  { %v490_v6 = vunpack.i.h.bf16 %v488_v4  ;;  %v489_v7 = vunpack.i.l.bf16 %v488_v4  ;;  %v217_v4 = vperm.slane %v214_v57, 1 }
  0x66   :  { %v112_v16 = vsel %vm111_vm2, %v489_v7, %v490_v6 }
  0x6b   :  { %v110_v5 = vpop.permute.xlu2 %109 }
  0x6c   :  { %v113_v22 = vsel %vm111_vm2, %v490_v6, %v110_v5 }
  0x73   :  { %v498_v17 = vpop.permute.xlu2 %497 }
  0x74   :  { %v500_v25 = vunpack.i.h.bf16 %v498_v17  ;;  %v499_v26 = vunpack.i.l.bf16 %v498_v17 }
  0x76   :  { %v88_v34 = vsel %vm87_vm4, %v499_v26, %v500_v25 }
  0x7a   :  { %v483_v8 = vpop.permute.xlu1 %482  ;;  %v478_v9 = vpop.permute.xlu0 %477 }
  0x7b   :  { %v485_v10 = vunpack.i.h.bf16 %v483_v8  ;;  %v484_v11 = vunpack.i.l.bf16 %v483_v8  ;;  %v480_v12 = vunpack.i.h.bf16 %v478_v9  ;;  %v479_v13 = vunpack.i.l.bf16 %v478_v9  ;;  %v74_v31 = vpop.permute.xlu2 %73 }
  0x7c   :  { %v218_v9 = vperm.slane %v214_v57, 2 }
  0x7d   :  { %v136_v14 = vsel %vm135_vm0, %v479_v13, %v480_v12  ;;  %v124_v15 = vsel %vm123_vm1, %v484_v11, %v485_v10 }
  0x7e   :  { %158 = vmatpush.msra.mxu0 %v136_v14 }
  0x80   :  { %159 = vmatpush.msra.mxu0 %v124_v15 }
  0x82   :  { %v122_v18 = vpop.permute.xlu1 %121  ;;  %v134_v19 = vpop.permute.xlu0 %133  ;;  %160 = vmatpush.msra.mxu0 %v112_v16 }
  0x83   :  { %198 = vmatpush.msra.mxu2 %v134_v19  ;;  %v137_v20 = vsel %vm135_vm0, %v480_v12, %v134_v19  ;;  %v125_v21 = vsel %vm123_vm1, %v485_v10, %v122_v18  ;;  %v513_v42 = vpop.permute.xlu2 %512 }
  0x84   :  { %178 = vmatpush.msra.mxu1 %v137_v20  ;;  %v515_v43 = vunpack.i.h.bf16 %v513_v42  ;;  %v514_v44 = vunpack.i.l.bf16 %v513_v42 }
  0x85   :  { %199 = vmatpush.msra.mxu2 %v122_v18 }
  0x86   :  { %179 = vmatpush.msra.mxu1 %v125_v21  ;;  %v52_v51 = vsel %vm51_vm7, %v514_v44, %v515_v43 }
  0x87   :  { %200 = vmatpush.msra.mxu2 %v110_v5 }
  0x88   :  { %180 = vmatpush.msra.mxu1 %v113_v22 }
  0x8a   :  { %v493_v27 = vpop.permute.xlu0 %492  ;;  %v98_v28 = vpop.permute.xlu1 %97 }
  0x8b   :  { %v495_v29 = vunpack.i.h.bf16 %v493_v27  ;;  %v494_v30 = vunpack.i.l.bf16 %v493_v27  ;;  %201 = vmatpush.msra.mxu2 %v98_v28 }
  0x8d   :  { %v100_v32 = vsel %vm99_vm3, %v494_v30, %v495_v29  ;;  %v101_v33 = vsel %vm99_vm3, %v495_v29, %v98_v28 }
  0x8e   :  { %161 = vmatpush.msra.mxu0 %v100_v32  ;;  %181 = vmatpush.msra.mxu1 %v101_v33 }
  0x90   :  { %162 = vmatpush.msra.mxu0 %v88_v34 }
  0x92   :  { %v86_v35 = vpop.permute.xlu0 %85  ;;  %v503_v36 = vpop.permute.xlu1 %502 }
  0x93   :  { %202 = vmatpush.msra.mxu2 %v86_v35  ;;  %v505_v37 = vunpack.i.h.bf16 %v503_v36  ;;  %v504_v38 = vunpack.i.l.bf16 %v503_v36  ;;  %v89_v39 = vsel %vm87_vm4, %v500_v25, %v86_v35 }
  0x94   :  { %182 = vmatpush.msra.mxu1 %v89_v39 }
  0x95   :  { %203 = vmatpush.msra.mxu2 %v74_v31  ;;  %v77_v40 = vsel %vm75_vm5, %v505_v37, %v74_v31  ;;  %v76_v41 = vsel %vm75_vm5, %v504_v38, %v505_v37 }
  0x96   :  { %183 = vmatpush.msra.mxu1 %v77_v40  ;;  %163 = vmatpush.msra.mxu0 %v76_v41  ;;  %v344_v40 = vld [vmem:[%s799_s4] sm:$0xff] }
  0x9a   :  { %v508_v45 = vpop.permute.xlu0 %507  ;;  %v62_v46 = vpop.permute.xlu1 %61 }
  0x9b   :  { %v510_v47 = vunpack.i.h.bf16 %v508_v45  ;;  %v509_v48 = vunpack.i.l.bf16 %v508_v45  ;;  %204 = vmatpush.msra.mxu2 %v62_v46 }
  0x9d   :  { %v64_v49 = vsel %vm63_vm6, %v509_v48, %v510_v47  ;;  %v65_v50 = vsel %vm63_vm6, %v510_v47, %v62_v46 }
  0x9e   :  { %164 = vmatpush.msra.mxu0 %v64_v49  ;;  %184 = vmatpush.msra.mxu1 %v65_v50 }
  0xa0   :  { %165 = vmatpush.msra.mxu0 %v52_v51 }
  0xa2   :  { %v50_v53 = vpop.permute.xlu0 %49  ;;  %166 = vmatpush.msra.mxu0 %v661_v0  ;;  %v145_v56 = vpop.permute.xlu1 %144 }
  0xa3   :  { %205 = vmatpush.msra.mxu2 %v50_v53  ;;  %v53_v54 = vsel %vm51_vm7, %v515_v43, %v50_v53  ;;  %457 = vmatmul.msk.f32.vlgmr.msra.gmra.mxu0 %vm147_vm8, %v38_v52 }
  0xa4   :  { %185 = vmatpush.msra.mxu1 %v53_v54  ;;  %v249_v54 = vld [vmem:[%s797_s2] sm:$0xff]  ;;  %s622_s2 = smov [#allocation6]  }
  0xa5   :  { %206 = vmatpush.msra.mxu2 %v670_v3  ;;  %s445_s16 = sshll.u32 %s622_s2, 4  ;;  %s446_s16 = int_to_ptr.vmem [resolvable:$true] %s445_s16 }
  0xa6   :  { %186 = vmatpush.msra.mxu1 %v663_v1  ;;  %459 = vmatmul.msk.f32.vlgmr.msra.gmra.mxu2 %vm147_vm8, %v38_v52 }
  0xa7   :  { %458 = vmatmul.msk.f32.vlgmr.msra.gmra.mxu1 %vm147_vm8, %v38_v52 }
 0x120   :  { %v168_v58 = vpop.f32.mrf.mxu0 }
 0x121   :  { %v169_v59 = vadd.f32 %v168_v58, %v145_v56 }
 0x123   :  { %v211_v61 = vmax.f32 %v169_v59, 0.0 }
 0x124   :  { %v188_v62 = vpop.f32.mrf.mxu1 }
 0x125   :  { %v222_v63 = vmul.f32 %v216_v60, %v211_v61  ;;  %v189_v2 = vadd.f32 %v188_v62, %v145_v56 }
 0x127   :  { %v212_v5 = vmax.f32 %v189_v2, 0.0  ;;  %232 = vrot.lane.b32.xlu2 %v222_v63, %s621_s13 }
 0x129   :  { %v223_v6 = vmul.f32 %v217_v4, %v212_v5  ;;  %v208_v7 = vpop.f32.mrf.mxu2 }
 0x12a   :  { %v209_v8 = vadd.f32 %v208_v7, %v145_v56 }
 0x12b   :  { %234 = vrot.lane.b32.xlu0 %v223_v6, %s621_s13 }
 0x12c   :  { %v213_v10 = vmax.f32 %v209_v8, 0.0 }
 0x12e   :  { %v224_v11 = vmul.f32 %v218_v9, %v213_v10 }
 0x130   :  { %236 = vrot.lane.b32.xlu1 %v224_v11, %s621_s13 }
 0x181   :  { %v233_v12 = vpop.permute.xlu2 %232 }
 0x182   :  { %245 = vst.msk [vmem:[#allocation2] sm:$0xff] %vm244_vm9, %v233_v12 }
 0x189   :  { %v726_v15 = vld [vmem:[#allocation2] sm:$0xff] }
 0x19d   :  { %v235_v13 = vpop.permute.xlu0 %234 }
 0x19e   :  { %v724_v14 = vsel %vm238_vm11, %v233_v12, %v235_v13 }
 0x19f   :  { %v527_v16 = vpack.i.bf16 %v724_v14, %v726_v15 }
 0x1a1   :  { %528 = vrot.lane.b32.xlu1 %v527_v16, %s613_s0  ;;  %523 = vrot.lane.b32.xlu0 %v527_v16, %s611_s26 }
 0x1a2   :  { %v237_v17 = vpop.permute.xlu1 %236  ;;  %518 = vrot.lane.b32.xlu2 %v527_v16, %s612_s27 }
 0x1a3   :  { %v240_v18 = vsel %vm238_vm11, %v235_v13, %v237_v17 }
 0x1a4   :  { %248 = vst.msk [vmem:[#allocation2 + $0x10] sm:$0xff] %vm247_vm12, %v240_v18 }
 0x1a9   :  { %538 = vrot.lane.b32.xlu1 %v527_v16, %s615_s29  ;;  %543 = vrot.lane.b32.xlu0 %v527_v16, %s616_s30 }
 0x1aa   :  { %533 = vrot.lane.b32.xlu2 %v527_v16, %s614_s28 }
 0x1ab   :  { %v736_v19 = vld [vmem:[#allocation2 + $0x10] sm:$0xff] }
 0x1b1   :  { %553 = vrot.lane.b32.xlu1 %v527_v16, %s618_s8  ;;  %337 = vrot.lane.b32.xlu0 %v736_v19, %s612_s27 }
 0x1b2   :  { %548 = vrot.lane.b32.xlu2 %v527_v16, %s617_s7 }
 0x1b9   :  { %315 = vrot.lane.b32.xlu1 %v736_v19, %s613_s0  ;;  %304 = vrot.lane.b32.xlu0 %v736_v19, %s614_s28 }
 0x1ba   :  { %326 = vrot.lane.b32.xlu2 %v736_v19, %s611_s26 }
 0x1c1   :  { %271 = vrot.lane.b32.xlu1 %v736_v19, %s617_s7  ;;  %282 = vrot.lane.b32.xlu0 %v736_v19, %s616_s30 }
 0x1c2   :  { %293 = vrot.lane.b32.xlu2 %v736_v19, %s615_s29 }
 0x1c9   :  { %419 = vrot.lane.b32.xlu1 %v661_v0, %s615_s29  ;;  %347 = vperm.xlu0 %557, %v344_v40  }
 0x1ca   :  { %260 = vrot.lane.b32.xlu2 %v736_v19, %s618_s8 }
 0x1d1   :  { %423 = vrot.lane.b32.xlu1 %v670_v3, %s615_s29 }
 0x1d2   :  { %421 = vrot.lane.b32.xlu2 %v663_v1, %s615_s29 }
 0x1fc   :  { %v519_v20 = vpop.permute.xlu2 %518 }
 0x1fd   :  { %v521_v21 = vunpack.i.h.bf16 %v519_v20  ;;  %v520_v22 = vunpack.i.l.bf16 %v519_v20 }
 0x1ff   :  { %v339_v23 = vsel %vm135_vm0, %v520_v22, %v521_v21 }
 0x200   :  { %360 = vmatpush.msra.mxu3 %v339_v23 }
 0x204   :  { %v534_v24 = vpop.permute.xlu2 %533 }
 0x205   :  { %v536_v30 = vunpack.i.h.bf16 %v534_v24  ;;  %v535_v31 = vunpack.i.l.bf16 %v534_v24 }
 0x207   :  { %v306_v33 = vsel %vm99_vm3, %v535_v31, %v536_v30 }
 0x20c   :  { %v549_v32 = vpop.permute.xlu2 %548 }
 0x20d   :  { %v551_v41 = vunpack.i.h.bf16 %v549_v32  ;;  %v550_v42 = vunpack.i.l.bf16 %v549_v32 }
 0x20f   :  { %v273_v46 = vsel %vm63_vm6, %v550_v42, %v551_v41 }
 0x213   :  { %v529_v25 = vpop.permute.xlu1 %528  ;;  %v524_v26 = vpop.permute.xlu0 %523 }
 0x214   :  { %v531_v27 = vunpack.i.h.bf16 %v529_v25  ;;  %v530_v0 = vunpack.i.l.bf16 %v529_v25  ;;  %v526_v28 = vunpack.i.h.bf16 %v524_v26  ;;  %v525_v29 = vunpack.i.l.bf16 %v524_v26  ;;  %v327_v45 = vpop.permute.xlu2 %326 }
 0x216   :  { %v328_v3 = vsel %vm123_vm1, %v525_v29, %v526_v28  ;;  %v317_v1 = vsel %vm111_vm2, %v530_v0, %v531_v27  ;;  %v329_v53 = vsel %vm123_vm1, %v526_v28, %v327_v45 }
 0x217   :  { %361 = vmatpush.msra.mxu3 %v328_v3 }
 0x219   :  { %362 = vmatpush.msra.mxu3 %v317_v1 }
 0x21b   :  { %v539_v34 = vpop.permute.xlu1 %538  ;;  %v544_v35 = vpop.permute.xlu0 %543  ;;  %363 = vmatpush.msra.mxu3 %v306_v33 }
 0x21c   :  { %v541_v36 = vunpack.i.h.bf16 %v539_v34  ;;  %v540_v37 = vunpack.i.l.bf16 %v539_v34  ;;  %v546_v38 = vunpack.i.h.bf16 %v544_v35  ;;  %v545_v39 = vunpack.i.l.bf16 %v544_v35  ;;  %v294_v58 = vpop.permute.xlu2 %293 }
 0x21e   :  { %v295_v43 = vsel %vm87_vm4, %v540_v37, %v541_v36  ;;  %v284_v44 = vsel %vm75_vm5, %v545_v39, %v546_v38  ;;  %v296_v60 = vsel %vm87_vm4, %v541_v36, %v294_v58 }
 0x21f   :  { %364 = vmatpush.msra.mxu3 %v295_v43 }
 0x221   :  { %365 = vmatpush.msra.mxu3 %v284_v44 }
 0x223   :  { %v554_v47 = vpop.permute.xlu1 %553  ;;  %v338_v48 = vpop.permute.xlu0 %337  ;;  %366 = vmatpush.msra.mxu3 %v273_v46 }
 0x224   :  { %v556_v49 = vunpack.i.h.bf16 %v554_v47  ;;  %v555_v50 = vunpack.i.l.bf16 %v554_v47  ;;  %400 = vmatpush.msrb.mxu1 %v338_v48  ;;  %v340_v51 = vsel %vm135_vm0, %v521_v21, %v338_v48  ;;  %v261_v4 = vpop.permute.xlu2 %260 }
 0x225   :  { %380 = vmatpush.msrb.mxu0 %v340_v51 }
 0x226   :  { %401 = vmatpush.msrb.mxu1 %v327_v45  ;;  %v262_v52 = vsel %vm51_vm7, %v555_v50, %v556_v49  ;;  %v263_v5 = vsel %vm51_vm7, %v556_v49, %v261_v4 }
 0x227   :  { %367 = vmatpush.msra.mxu3 %v262_v52  ;;  %381 = vmatpush.msrb.mxu0 %v329_v53 }
 0x229   :  { %368 = vmatpush.msra.mxu3 %v726_v15 }
 0x22a   :  { %460 = vmatmul.msk.f32.vlgmr.msra.gmra.mxu3 %vm147_vm8, %v249_v54 }
 0x22b   :  { %v316_v55 = vpop.permute.xlu1 %315  ;;  %v305_v56 = vpop.permute.xlu0 %304 }
 0x22c   :  { %402 = vmatpush.msrb.mxu1 %v316_v55  ;;  %v318_v57 = vsel %vm111_vm2, %v531_v27, %v316_v55  ;;  %v307_v59 = vsel %vm99_vm3, %v536_v30, %v305_v56  ;;  %v422_v7 = vpop.permute.xlu2 %421 }
 0x22d   :  { %382 = vmatpush.msrb.mxu0 %v318_v57 }
 0x22e   :  { %403 = vmatpush.msrb.mxu1 %v305_v56 }
 0x22f   :  { %383 = vmatpush.msrb.mxu0 %v307_v59 }
 0x230   :  { %404 = vmatpush.msrb.mxu1 %v294_v58 }
 0x231   :  { %384 = vmatpush.msrb.mxu0 %v296_v60 }
 0x233   :  { %v272_v61 = vpop.permute.xlu1 %271  ;;  %v283_v62 = vpop.permute.xlu0 %282 }
 0x234   :  { %405 = vmatpush.msrb.mxu1 %v283_v62  ;;  %v285_v63 = vsel %vm75_vm5, %v546_v38, %v283_v62  ;;  %v274_v2 = vsel %vm63_vm6, %v551_v41, %v272_v61 }
 0x235   :  { %385 = vmatpush.msrb.mxu0 %v285_v63 }
 0x236   :  { %406 = vmatpush.msrb.mxu1 %v272_v61 }
 0x237   :  { %386 = vmatpush.msrb.mxu0 %v274_v2 }
 0x238   :  { %407 = vmatpush.msrb.mxu1 %v261_v4 }
 0x239   :  { %387 = vmatpush.msrb.mxu0 %v263_v5 }
 0x23a   :  { %408 = vmatpush.msrb.mxu1 %v736_v19 }
 0x23b   :  { %388 = vmatpush.msrb.mxu0 %v724_v14  ;;  %462 = vmatmul.msk.f32.vlgmr.msrb.gmra.mxu1 %vm147_vm8, %v249_v54  ;;  %v420_v6 = vpop.permute.xlu1 %419  ;;  %v348_v8 = vpop.permute.xlu0 %347 }
 0x23c   :  { %461 = vmatmul.msk.f32.vlgmr.msrb.gmra.mxu0 %vm147_vm8, %v249_v54  ;;  %v425_v10 = vsel %vm87_vm4, %v420_v6, %v422_v7 }
 0x243   :  { %v424_v15 = vpop.permute.xlu1 %423 }
 0x244   :  { %v426_v14 = vsel %vm87_vm4, %v422_v7, %v424_v15 }
 0x2ad   :  { %v370_v9 = vpop.f32.mrf.mxu3 }
 0x2ae   :  { %v371_v11 = vadd.f32 %v370_v9, %v348_v8 }
 0x2b0   :  { %v430_v12 = vadd.f32 %v425_v10, %v371_v11 }
 0x2b2   :  { %v433_v13 = vmax.f32 %v430_v12, 0.0 }
 0x2b4   :  { %436 = vst [vmem:[#allocation6] sm:$0xff] %v433_v13 }
 0x2b8   :  { %v410_v16 = vpop.f32.mrf.mxu1 }
 0x2b9   :  { %v411_v17 = vadd.f32 %v410_v16, %v348_v8  ;;  %v390_v18 = vpop.f32.mrf.mxu0 }
 0x2ba   :  { %v391_v19 = vadd.f32 %v390_v18, %v348_v8 }
 0x2bb   :  { %v432_v20 = vadd.f32 %v424_v15, %v411_v17 }
 0x2bc   :  { %v431_v21 = vadd.f32 %v426_v14, %v391_v19 }
 0x2bd   :  { %v435_v22 = vmax.f32 %v432_v20, 0.0 }
 0x2be   :  { %v434_v23 = vmax.f32 %v431_v21, 0.0 }
 0x2bf   :  { %439 = vst.msk [vmem:[#allocation6 + $0x10] sm:$0xff] %vm438_vm13, %v435_v22 }
 0x2c0   :  { %437 = vst [vmem:[#allocation6 + $0x8] sm:$0xff] %v434_v23 }
 0x2c1   :  { %450 = dma.vmem_to_hbm [thread:$0]  %s446_s16, 384, %s448_s19, [#allocation5]  }
 0x2c2   :  { %608 = dma.done.wait [#allocation5], 384  }
 0x2c3   :  { %609 = vsyncadd [#allocation5], 4294966912 }
 0x2c4   :  { %455 = vsyncpa [#allocation4], 1 }
 0x2c5   :  { %456 = vsyncpa [#allocation5], 1 }

</bundles_post_ra>
